<compile_context>
chip_gen: v7x
topology: tpu7x:2x2x1
jax: 0.10.0
libtpu: 0.0.40
codegen_flags: <defaults>
</compile_context>

<pallas_src>
import functools

import jax
import jax.numpy as jnp
from jax.experimental import pallas as pl
from jax.experimental.pallas import tpu as pltpu


# ----------------------------------------------------------------------------
# Small helpers
# ----------------------------------------------------------------------------
def _round_up(v, m):
    return (v + m - 1) // m * m


def _round_down(v, m):
    return (v // m) * m


def _sublane(dtype):
    # Native sublane granule: 8 for 32-bit, 16 for 16-bit, 32 for 8-bit.
    return {4: 8, 2: 16, 1: 32}.get(jnp.dtype(dtype).itemsize, 8)


def _vmem_capacity_bytes():
    """Physical VMEM per TensorCore (128 MiB v5e/v6e, 64 MiB v7x)."""
    try:
        return int(pltpu.get_tpu_info().vmem_capacity_bytes)
    except Exception:
        return 64 * 2**20                      # conservative fallback (v7x)


_SINGLE_BUFFER_OK = None


def _probe_copy_kernel(x_ref, o_ref):
    o_ref[...] = x_ref[...]


def _resident_kwargs():
    """BlockSpec kwargs that single-buffer a block with a constant index_map.

    Revisited blocks are DMA'd only once, so the default double buffer is pure
    wasted VMEM.  Probed once (compile + numeric check) so jax versions
    without pipeline_mode support fall back to default buffering cleanly.
    """
    global _SINGLE_BUFFER_OK
    if _SINGLE_BUFFER_OK is None:
        try:
            kw = {"pipeline_mode": pl.Buffered(1)}
            probe = pl.pallas_call(
                _probe_copy_kernel,
                out_shape=jax.ShapeDtypeStruct((16, 128), jnp.float32),
                grid=(2,),
                in_specs=[pl.BlockSpec((8, 128), lambda i: (0, 0), **kw)],
                out_specs=pl.BlockSpec((8, 128), lambda i: (i, 0)),
            )
            xp = jnp.arange(8 * 128, dtype=jnp.float32).reshape(8, 128)
            out = jax.block_until_ready(probe(xp))
            _SINGLE_BUFFER_OK = bool(jnp.all(out[:8] == xp)) and bool(
                jnp.all(out[8:] == xp))
        except Exception:
            _SINGLE_BUFFER_OK = False
    return {"pipeline_mode": pl.Buffered(1)} if _SINGLE_BUFFER_OK else {}


def _compiler_params(semantics, est_vmem, cap):
    # Generation-aware scoped-VMEM limit: up to (capacity - headroom).
    limit = int(min(max(2 * est_vmem, 32 * 2**20), cap - (2 << 20)))
    return pltpu.CompilerParams(dimension_semantics=semantics,
                                vmem_limit_bytes=limit)


def _pick_rows(n, cap_rows, gran):
    """Row-tile size: as large as the VMEM budget allows, but split the batch
    in two when the grid would otherwise have one step (feed both v7x TCs)."""
    cap_rows = max(gran, _round_down(cap_rows, gran))
    if n <= cap_rows:
        half = _round_up((n + 1) // 2, gran)
        full = _round_up(n, gran)
        return half if half < full else full
    return cap_rows


# ----------------------------------------------------------------------------
# Kernels
# ----------------------------------------------------------------------------
def _linear_kernel(x_ref, w_ref, b_ref, o_ref, *, mxu_dtype):
    # y = x @ W + b  (MXU matmul, f32 accumulation).  W is already mxu_dtype.
    y = jnp.dot(x_ref[...].astype(mxu_dtype), w_ref[...],
                preferred_element_type=jnp.float32)
    o_ref[...] = (y + b_ref[...]).astype(o_ref.dtype)


def _linear_bn_kernel(x_ref, w_ref, gamma_ref, beta_ref, o_ref, *,
                      mxu_dtype, n_valid, n_block):
    # Fused Linear + training-mode BN: full batch resident, one K tile/step.
    # The Linear bias is omitted -- BN subtracts the batch mean, cancelling it.
    y = jnp.dot(x_ref[...].astype(mxu_dtype), w_ref[...],
                preferred_element_type=jnp.float32)
    inv_n = 1.0 / float(n_valid)
    # Zero-padded batch rows give y == 0 exactly, so the mean needs no mask.
    mean = jnp.sum(y, axis=0, keepdims=True) * inv_n
    d = y - mean
    if n_valid != n_block:
        # Centered values of padded rows are -mean (not 0): mask them out of
        # the two-pass (cancellation-free) variance.
        row = jax.lax.broadcasted_iota(jnp.int32, d.shape, 0)
        d_stat = jnp.where(row < n_valid, d, 0.0)
    else:
        d_stat = d
    var = jnp.sum(d_stat * d_stat, axis=0, keepdims=True) * inv_n
    inv_std = jax.lax.rsqrt(var + 1e-5)
    o_ref[...] = (d * (inv_std * gamma_ref[...]) + beta_ref[...]).astype(o_ref.dtype)


def _linear_stats_kernel(x_ref, w_ref, y_ref, sum_ref, sumsq_ref, *,
                         mxu_dtype, n_valid, tile_rows):
    # Streaming BN pass 1: write the y row tile and accumulate per-feature
    # sum / sum-of-squares across the ("arbitrary") batch grid axis.
    i = pl.program_id(0)

    @pl.when(i == 0)
    def _():
        sum_ref[...] = jnp.zeros_like(sum_ref)
        sumsq_ref[...] = jnp.zeros_like(sumsq_ref)

    y = jnp.dot(x_ref[...].astype(mxu_dtype), w_ref[...],
                preferred_element_type=jnp.float32)
    y_ref[...] = y
    if n_valid % tile_rows != 0:
        # Ragged last tile reads garbage rows (x is not padded); keep them out
        # of the statistics.  Their y_ref stores are masked by Pallas anyway.
        row = i * tile_rows + jax.lax.broadcasted_iota(jnp.int32, y.shape, 0)
        y = jnp.where(row < n_valid, y, 0.0)
    sum_ref[...] += jnp.sum(y, axis=0, keepdims=True)
    sumsq_ref[...] += jnp.sum(y * y, axis=0, keepdims=True)


def _scale_shift_kernel(y_ref, a_ref, c_ref, o_ref):
    # Streaming BN pass 2: out = y * a + c, a = gamma/std, c = beta - mean*a.
    o_ref[...] = (y_ref[...] * a_ref[...] + c_ref[...]).astype(o_ref.dtype)


# ----------------------------------------------------------------------------
# Path builders
# ----------------------------------------------------------------------------
def _forward_ori(x, w_p, b2, *, out_dtype, mxu_dtype, tm, gran, cap, budget, res):
    n, f = x.shape
    k_pad = w_p.shape[1]
    x_item = jnp.dtype(x.dtype).itemsize
    w_item = jnp.dtype(w_p.dtype).itemsize
    out_item = jnp.dtype(out_dtype).itemsize

    # Streamed bytes per batch row: double-buffered x and out tiles plus the
    # f32 matmul result; W / b are resident and fetched once.
    row_bytes = 2 * f * x_item + k_pad * (2 * out_item + 4)
    fixed = (1 if res else 2) * f * k_pad * w_item + 4 * k_pad * 4
    tm_req = tm if tm is not None else (1024 if cap >= 96 * 2**20 else 512)
    cap_rows = max(gran, (budget - fixed) // row_bytes) if budget > fixed else gran
    tm_eff = _pick_rows(n, min(_round_up(tm_req, gran), cap_rows), gran)
    grid = (pl.cdiv(n, tm_eff),)

    est_vmem = tm_eff * row_bytes + fixed
    flops = 2 * n * f * k_pad
    bytes_accessed = (n * f * x_item + f * k_pad * w_item + k_pad * 4
                      + n * k_pad * out_item)

    return pl.pallas_call(
        functools.partial(_linear_kernel, mxu_dtype=mxu_dtype),
        out_shape=jax.ShapeDtypeStruct((n, k_pad), out_dtype),
        grid=grid,
        in_specs=[
            pl.BlockSpec((tm_eff, f), lambda i: (i, 0)),          # x row tile
            pl.BlockSpec((f, k_pad), lambda i: (0, 0), **res),    # W resident
            pl.BlockSpec((1, k_pad), lambda i: (0, 0), **res),    # b resident
        ],
        out_specs=pl.BlockSpec((tm_eff, k_pad), lambda i: (i, 0)),
        compiler_params=_compiler_params(("parallel",), est_vmem, cap),
        cost_estimate=pl.CostEstimate(flops=flops, transcendentals=0,
                                      bytes_accessed=bytes_accessed),
    )(x, w_p, b2)


def _forward_bn(x, w_p, g2, be2, *, out_dtype, mxu_dtype, tm, tk, gran, cap,
                budget, res, bn_stream):
    n, f = x.shape
    k_pad = w_p.shape[1]
    x_item = jnp.dtype(x.dtype).itemsize
    w_item = jnp.dtype(w_p.dtype).itemsize
    out_item = jnp.dtype(out_dtype).itemsize
    n_pad = _round_up(n, gran)

    # K tile for the batch-resident kernel; aim for >= 2 grid steps (megacore).
    tk_eff = min(k_pad, _round_up(min(tk, k_pad), 128))
    if k_pad // tk_eff < 2 and k_pad >= 256:
        tk_eff = max(128, _round_down(k_pad // 2, 128))

    resident_bytes = ((1 if res else 2) * n_pad * f * x_item   # resident x
                      + 2 * f * tk_eff * w_item                # W tiles
                      + 2 * n_pad * tk_eff * out_item          # out tiles
                      + 3 * n_pad * tk_eff * 4                 # y, d, d_stat
                      + 8 * tk_eff * 4)                        # gamma/beta/stats
    stream = bn_stream if bn_stream is not None else resident_bytes > budget

    if not stream:
        # ---- Fused kernel: full batch resident, grid over K tiles ----------
        # x is zero-padded to the sublane granule only when needed (padded
        # rows of y are then exactly 0, since the bias was dropped).
        x_p = jnp.pad(x, ((0, n_pad - n), (0, 0))) if n_pad != n else x
        grid = (pl.cdiv(k_pad, tk_eff),)
        flops = 2 * n_pad * f * k_pad
        bytes_accessed = (n_pad * f * x_item + f * k_pad * w_item
                          + 2 * k_pad * 4 + n * k_pad * out_item)
        return pl.pallas_call(
            functools.partial(_linear_bn_kernel, mxu_dtype=mxu_dtype,
                              n_valid=n, n_block=n_pad),
            out_shape=jax.ShapeDtypeStruct((n, k_pad), out_dtype),
            grid=grid,
            in_specs=[
                pl.BlockSpec((n_pad, f), lambda j: (0, 0), **res),  # x resident
                pl.BlockSpec((f, tk_eff), lambda j: (0, j)),        # W K-tile
                pl.BlockSpec((1, tk_eff), lambda j: (0, j)),        # gamma tile
                pl.BlockSpec((1, tk_eff), lambda j: (0, j)),        # beta tile
            ],
            out_specs=pl.BlockSpec((n_pad, tk_eff), lambda j: (0, j)),
            compiler_params=_compiler_params(("parallel",), resident_bytes, cap),
            cost_estimate=pl.CostEstimate(flops=flops, transcendentals=k_pad,
                                          bytes_accessed=bytes_accessed),
        )(x_p, w_p, g2, be2)

    # ---- Streaming BN: pass 1 (y + sum/sumsq), pass 2 (y * a + c) ----------
    row_bytes = 2 * f * x_item + 3 * k_pad * 4        # x tiles + y tiles + temp
    fixed = (1 if res else 2) * f * k_pad * w_item + 6 * k_pad * 4
    tm_req = tm if tm is not None else (1024 if cap >= 96 * 2**20 else 512)
    cap_rows = max(gran, (budget - fixed) // row_bytes) if budget > fixed else gran
    tm_eff = _pick_rows(n, min(_round_up(tm_req, gran), cap_rows), gran)
    grid = (pl.cdiv(n, tm_eff),)

    est1 = tm_eff * row_bytes + fixed
    y, s, ss = pl.pallas_call(
        functools.partial(_linear_stats_kernel, mxu_dtype=mxu_dtype,
                          n_valid=n, tile_rows=tm_eff),
        out_shape=(jax.ShapeDtypeStruct((n, k_pad), jnp.float32),
                   jax.ShapeDtypeStruct((1, k_pad), jnp.float32),
                   jax.ShapeDtypeStruct((1, k_pad), jnp.float32)),
        grid=grid,
        in_specs=[
            pl.BlockSpec((tm_eff, f), lambda i: (i, 0)),           # x row tile
            pl.BlockSpec((f, k_pad), lambda i: (0, 0), **res),     # W resident
        ],
        out_specs=(
            pl.BlockSpec((tm_eff, k_pad), lambda i: (i, 0)),       # y row tile
            pl.BlockSpec((1, k_pad), lambda i: (0, 0)),            # sum (acc)
            pl.BlockSpec((1, k_pad), lambda i: (0, 0)),            # sumsq (acc)
        ),
        compiler_params=_compiler_params(("arbitrary",), est1, cap),
        cost_estimate=pl.CostEstimate(
            flops=2 * n * f * k_pad, transcendentals=0,
            bytes_accessed=n * f * x_item + f * k_pad * w_item + n * k_pad * 4),
    )(x, w_p)

    # Tiny (1, K) stats math between the two calls.
    # TODO(synk): the streaming path uses one-pass E[y^2]-mean^2 (required for
    # a single sweep over the batch); it is less robust than the centered form
    # when |mean| >> std.
    inv_n = 1.0 / float(n)
    mean = s * inv_n
    var = jnp.maximum(ss * inv_n - mean * mean, 0.0)
    a = g2 * jax.lax.rsqrt(var + 1e-5)
    c = be2 - mean * a

    est2 = tm_eff * k_pad * (2 * 4 + 2 * out_item) + 4 * k_pad * 4
    return pl.pallas_call(
        _scale_shift_kernel,
        out_shape=jax.ShapeDtypeStruct((n, k_pad), out_dtype),
        grid=grid,
        in_specs=[
            pl.BlockSpec((tm_eff, k_pad), lambda i: (i, 0)),       # y row tile
            pl.BlockSpec((1, k_pad), lambda i: (0, 0), **res),     # a resident
            pl.BlockSpec((1, k_pad), lambda i: (0, 0), **res),     # c resident
        ],
        out_specs=pl.BlockSpec((tm_eff, k_pad), lambda i: (i, 0)),
        compiler_params=_compiler_params(("parallel",), est2, cap),
        cost_estimate=pl.CostEstimate(
            flops=2 * n * k_pad, transcendentals=0,
            bytes_accessed=n * k_pad * (4 + out_item)),
    )(y, a, c)


# ----------------------------------------------------------------------------
# Public wrapper
# ----------------------------------------------------------------------------
def feat_bottleneck_forward(x, w_t, b, gamma, beta, bottleneck_type="ori", *,
                            mxu_dtype=jnp.float32, out_dtype=jnp.float32,
                            tm=None, tk=512, bn_stream=None):
    """Forward pass of feat_bottleneck.

    x: (N, F); w_t: (F, K) = nn.Linear weight transposed; b/gamma/beta: (K,).
    bottleneck_type: 'ori' (Linear only) or 'bn' (Linear + training-mode BN).
    bn_stream: None = auto (by VMEM budget); True/False force the streaming /
               batch-resident BN implementation.
    """
    n, f = x.shape
    fw, k = w_t.shape
    assert fw == f, "weight must be (feature_dim, bottleneck_dim)"

    cap = _vmem_capacity_bytes()
    budget = int(cap * 0.6)                 # headroom for compiler temporaries
    res = _resident_kwargs()
    gran = max(_sublane(x.dtype), _sublane(out_dtype))

    # Cast W once in the wrapper so DMAs move the MXU dtype (bf16 W halves its
    # HBM read + VMEM residency); bias / BN params stay f32.
    if w_t.dtype != jnp.dtype(mxu_dtype):
        w_t = w_t.astype(mxu_dtype)

    # Lane-dense K (multiple of 128): full-width vst instead of masked vst.msk.
    # With the module default bottleneck_dim=256 this is a no-op (no pad/slice).
    k_pad = _round_up(k, 128)
    if k_pad != k:
        w_t = jnp.pad(w_t, ((0, 0), (0, k_pad - k)))
        b = jnp.pad(b, (0, k_pad - k))
        gamma = jnp.pad(gamma, (0, k_pad - k))
        beta = jnp.pad(beta, (0, k_pad - k))
    b2 = b.reshape(1, k_pad).astype(jnp.float32)
    g2 = gamma.reshape(1, k_pad).astype(jnp.float32)
    be2 = beta.reshape(1, k_pad).astype(jnp.float32)

    if bottleneck_type == "bn":
        out = _forward_bn(x, w_t, g2, be2, out_dtype=out_dtype,
                          mxu_dtype=mxu_dtype, tm=tm, tk=tk, gran=gran,
                          cap=cap, budget=budget, res=res, bn_stream=bn_stream)
    else:
        out = _forward_ori(x, w_t, b2, out_dtype=out_dtype,
                           mxu_dtype=mxu_dtype, tm=tm, gran=gran,
                           cap=cap, budget=budget, res=res)

    return out[:, :k] if k_pad != k else out


# ----------------------------------------------------------------------------
# Reference + demo
# ----------------------------------------------------------------------------
def _reference(x, w_t, b, gamma, beta, bottleneck_type):
    y = x @ w_t + b[None, :]
    if bottleneck_type == "bn":
        mean = y.mean(axis=0, keepdims=True)
        var = ((y - mean) ** 2).mean(axis=0, keepdims=True)
        y = (y - mean) / jnp.sqrt(var + 1e-5) * gamma[None, :] + beta[None, :]
    return y


if __name__ == "__main__":
    # Small shapes consistent with the module: batch=8, feature_dim=32,
    # bottleneck_dim=256 (module default).
    batch, feature_dim, bottleneck_dim = 8, 32, 256

    key = jax.random.PRNGKey(0)
    k_x, k_w, k_b = jax.random.split(key, 3)

    x = jax.random.normal(k_x, (batch, feature_dim), dtype=jnp.float32)
    bound = 1.0 / (feature_dim ** 0.5)      # nn.Linear default init
    w_t = jax.random.uniform(k_w, (feature_dim, bottleneck_dim),
                             minval=-bound, maxval=bound, dtype=jnp.float32)
    b = jax.random.uniform(k_b, (bottleneck_dim,),
                           minval=-bound, maxval=bound, dtype=jnp.float32)
    gamma = jnp.ones((bottleneck_dim,), dtype=jnp.float32)   # BN affine init
    beta = jnp.zeros((bottleneck_dim,), dtype=jnp.float32)

    cases = [
        ("ori", jnp.float32, None, 1e-4),    # streamed Linear
        ("bn", jnp.float32, False, 1e-4),    # fused batch-resident BN
        ("bn", jnp.float32, True, 1e-4),     # streaming sum/sumsq BN
        ("ori", jnp.bfloat16, None, 1e-1),   # bf16 MXU fast path
        ("bn", jnp.bfloat16, None, 1e-1),
    ]
    ok = True
    for btype, mdt, stream, tol in cases:
        ref = _reference(x, w_t, b, gamma, beta, btype)
        out = jax.block_until_ready(
            feat_bottleneck_forward(x, w_t, b, gamma, beta, btype,
                                    mxu_dtype=mdt, bn_stream=stream))
        ok = ok and bool(jnp.allclose(out, ref, atol=tol, rtol=tol))

    print("KERNEL_OK" if ok else "KERNEL_MISMATCH")
</pallas_src>

<mosaic_0001>
module attributes {stable_mosaic.version = 11 : i64} {
  func.func @_probe_copy_kernel(%arg0: i32, %arg1: memref<8x128xf32, #tpu.memory_space<vmem>>, %arg2: memref<8x128xf32, #tpu.memory_space<vmem>>) attributes {dimension_semantics = [#tpu.dimension_semantics<arbitrary>], iteration_bounds = array<i64: 2>, scalar_prefetch = 0 : i64, scratch_operands = 0 : i64, tpu.core_type = #tpu.core_type<tc>, window_params = [{pipeline_mode = #tpu.pipeline_mode<synchronous>, transform_indices = @transform_0, window_bounds = array<i64: 8, 128>}, {transform_indices = @transform_1, window_bounds = array<i64: 8, 128>}]} {
    %c0 = arith.constant 0 : index
    %c0_0 = arith.constant 0 : index
    %0 = vector.load %arg1[%c0, %c0_0] : memref<8x128xf32, #tpu.memory_space<vmem>>, vector<8x128xf32>
    %c0_1 = arith.constant 0 : index
    %c0_2 = arith.constant 0 : index
    %1 = vector.load %arg2[%c0_1, %c0_2] : memref<8x128xf32, #tpu.memory_space<vmem>>, vector<8x128xf32>
    tpu.vector_store %arg2[%c0_1, %c0_2], %0 {strides = array<i32>} : memref<8x128xf32, #tpu.memory_space<vmem>>, vector<8x128xf32>,
    return
  }
  func.func @transform_0(%arg0: i32) -> (i32, i32) {
    %c0_i32 = arith.constant 0 : i32
    %c0_i32_0 = arith.constant 0 : i32
    %c0_i32_1 = arith.constant 0 : i32
    return %c0_i32, %c0_i32_0 : i32, i32
  }
  func.func @transform_1(%arg0: i32) -> (i32, i32) {
    %c0_i32 = arith.constant 0 : i32
    %c0_i32_0 = arith.constant 0 : i32
    return %arg0, %c0_i32 : i32, i32
  }
}

module attributes {stable_mosaic.version = 11 : i64} {
  func.func @_linear_kernel(%arg0: i32, %arg1: memref<8x32xf32, #tpu.memory_space<vmem>>, %arg2: memref<32x256xf32, #tpu.memory_space<vmem>>, %arg3: memref<1x256xf32, #tpu.memory_space<vmem>>, %arg4: memref<8x256xf32, #tpu.memory_space<vmem>>) attributes {dimension_semantics = [#tpu.dimension_semantics<parallel>], iteration_bounds = array<i64: 1>, scalar_prefetch = 0 : i64, scratch_operands = 0 : i64, tpu.core_type = #tpu.core_type<tc>, window_params = [{transform_indices = @transform_0, window_bounds = array<i64: 8, 32>}, {pipeline_mode = #tpu.pipeline_mode<synchronous>, transform_indices = @transform_1, window_bounds = array<i64: 32, 256>}, {pipeline_mode = #tpu.pipeline_mode<synchronous>, transform_indices = @transform_2, window_bounds = array<i64: 1, 256>}, {transform_indices = @transform_3, window_bounds = array<i64: 8, 256>}]} {
    %c0 = arith.constant 0 : index
    %c0_0 = arith.constant 0 : index
    %0 = vector.load %arg1[%c0, %c0_0] : memref<8x32xf32, #tpu.memory_space<vmem>>, vector<8x32xf32>
    %c0_1 = arith.constant 0 : index
    %c0_2 = arith.constant 0 : index
    %1 = vector.load %arg2[%c0_1, %c0_2] : memref<32x256xf32, #tpu.memory_space<vmem>>, vector<32x256xf32>
    %cst = arith.constant dense<0.000000e+00> : vector<8x256xf32>
    %2 = tpu.matmul %0, %1, %cst {dimension_numbers = #tpu.dot_dimension_numbers<[1], [0], [0], [1], [0, 0, 1, 1], [], []>} : vector<8x32xf32>, vector<32x256xf32>, vector<8x256xf32> -> vector<8x256xf32>
    %c0_3 = arith.constant 0 : index
    %c0_4 = arith.constant 0 : index
    %3 = vector.load %arg3[%c0_3, %c0_4] : memref<1x256xf32, #tpu.memory_space<vmem>>, vector<1x256xf32>
    %4 = vector.broadcast %3 : vector<1x256xf32> to vector<8x256xf32>
    %5 = arith.addf %2, %4 : vector<8x256xf32>
    %c0_5 = arith.constant 0 : index
    %c0_6 = arith.constant 0 : index
    %6 = vector.load %arg4[%c0_5, %c0_6] : memref<8x256xf32, #tpu.memory_space<vmem>>, vector<8x256xf32>
    tpu.vector_store %arg4[%c0_5, %c0_6], %5 {strides = array<i32>} : memref<8x256xf32, #tpu.memory_space<vmem>>, vector<8x256xf32>,
    return
  }
  func.func @transform_0(%arg0: i32) -> (i32, i32) {
    %c0_i32 = arith.constant 0 : i32
    %c0_i32_0 = arith.constant 0 : i32
    return %arg0, %c0_i32 : i32, i32
  }
  func.func @transform_1(%arg0: i32) -> (i32, i32) {
    %c0_i32 = arith.constant 0 : i32
    %c0_i32_0 = arith.constant 0 : i32
    %c0_i32_1 = arith.constant 0 : i32
    return %c0_i32, %c0_i32_0 : i32, i32
  }
  func.func @transform_2(%arg0: i32) -> (i32, i32) {
    %c0_i32 = arith.constant 0 : i32
    %c0_i32_0 = arith.constant 0 : i32
    %c0_i32_1 = arith.constant 0 : i32
    return %c0_i32, %c0_i32_0 : i32, i32
  }
  func.func @transform_3(%arg0: i32) -> (i32, i32) {
    %c0_i32 = arith.constant 0 : i32
    %c0_i32_0 = arith.constant 0 : i32
    return %arg0, %c0_i32 : i32, i32
  }
}

</mosaic_0001>

<bundles_post_ra>
// kernel: tpu_custom_call.1
= control target key start
LH: loop header
LB: loop body
LE: loop exit
PB: predicated region body
PF: predicated region fallthrough
CT: control target
= control target key end

     0   :  { %6 = vsyncpa [#allocation3], 0  ;;  %s481_s0 = inlined_call_operand.hbm [shape: f32[8,128], index: 0, kind: input, shape index: {}]   ;;  %s482_s1 = inlined_call_operand.hbm [shape: f32[16,128], index: 1, kind: output, shape index: {}]  }
   0x1   :  { %7 = vsyncpa [#allocation4], 0 }
   0x2   :  { %9 = vsyncpa [#allocation4 + $0x1], 0  ;;  %s351_s6 = smov 0   ;;  %s353_s7 = smov 0  }
   0x3   :  { %s355_s8 = smov 0   ;;  %s357_s9 = smov 0  }
   0x4 LB: > { %s372_s10 = sadd.s32 4294967295, %s337_s9   ;;  %s183_s11 = sadd.s32 4294967294, %s337_s9   ;;  %s337_s9 = sphi %s357_s9, %s498_s9   ;;  %s333_s8 = sphi %s355_s8, %s497_s8   ;;  %s329_s7 = sphi %s353_s7, %s496_s7   ;;  %s325_s6 = sphi %s351_s6, %s495_s6  }
   0x5   : > { %s376_s12 = sadd.s32 1, %s337_s9   ;;  %s43_s13 = sadd.s32 1, %s333_s8 }
   0x6   : > { %s40_s14 = ssub.s32 %s337_s9, %s376_s12  ;;  %p53_p0 = scmp.ne.s32.totalorder %s333_s8, %s329_s7 }
   0x7   : > { %p41_p1 = scmp.eq.s32.totalorder %s40_s14, 0  ;;  %p54_p2 = scmp.eq.s32.totalorder %s372_s10, 1 }
   0x8   : > { %p59_p3 = scmp.ne.s32.totalorder %s329_s7, %s325_s6  ;;  %p60_p4 = scmp.eq.s32.totalorder %s183_s11, 1 }
   0x9   : > { %s387_s15 = scalar_select %p41_p1, %s333_s8, %s43_s13  }
   0xa   : > { %p389_p5 = por %p54_p2, %p53_p0  ;;  %p393_p6 = por %p60_p4, %p59_p3 }
   0xb   : > { %p184_p7 = scmp.ge.s32.totalorder %s337_s9, 1  ;;  %p67_p8 = scmp.lt.s32.totalorder %s337_s9, 3 }
   0xc   : > { %s486_s16 = scalar_select %p389_p5, 1, 0 }
   0xd   : > { %s487_s17 = scalar_select %p393_p6, 1, 0 }
   0xe   : > { %p483_p9 = scmp.eq.s32.totalorder %s372_s10, 0  ;;  %p400_p10 = pnand %p184_p7, %p67_p8 }
   0xf   : > { %s339_s19 = smov [#allocation2]   ;;  %s243_s24 = scalar_lea.hbm %s481_s0, 128 }
  0x10   : > { %s488_s18 = scalar_select %p400_p10, 1, 0 }
  0x11   : > { %s80_s20 = sshll.u32 %s339_s19, 4  ;;  %p199_p11 = pneg %p400_p10  ;;  %s81_s20 = int_to_ptr.vmem [resolvable:$true] %s80_s20 }
  0x12   : > { %p244_p13 = scmp.ne.s32.totalorder %s481_s0, %s243_s24  ;;  %p250_p3 = scmp.lt.u32.totalorder %s243_s24, %s481_s0 }
  0x13   : > { %p408_p12 = pnand %p483_p9, %p199_p11 }
  0x15   : > { %p245_p0 = pneg %p408_p12 }
  0x17   : > { %p246_p1 = pnand %p245_p0, %p244_p13 }
  0x19   : > { %p247_p2 = pneg %p246_p1 }
  0x1b   : > { %p252_p4 = pnand %p250_p3, %p247_p2 }
  0x1d   : > { %255 = shalt.err (!%p252_p4)
}
  0x1e   : > { %s256_s29 = scalar_lea.vmem %s81_s20, 128  ;;  %p264_p9 = scmp.lt.s32.totalorder %s81_s20, %s81_s20 }
  0x1f   : > { %p257_p7 = scmp.ne.s32.totalorder %s81_s20, %s256_s29  ;;  %p265_p6 = scmp.lt.s32.totalorder %s256_s29, %s256_s29 }
  0x21   : > { %p259_p8 = pnand %p257_p7, %p245_p0  ;;  %p266_p5 = por %p265_p6, %p264_p9 }
  0x23   : > { %p260_p11 = pneg %p259_p8 }
  0x25   : > { %p267_p10 = pnand %p266_p5, %p260_p11 }
  0x27   : > { %270 = shalt.err (!%p267_p10)
}
  0x28   : > { %202 = dma.hbm_to_vmem [thread:$0]  (!%p408_p12), %s481_s0, 128, %s81_s20, [#allocation3]  }
  0x29   : > { %p490_p13 = scmp.ne.s32.totalorder %s488_s18, 0 }
  0x2a   : > { %p491_p1 = scmp.eq.s32.totalorder (!%p490_p13), %s372_s10, 0 }
  0x2b   : > { %93 = sbr.rel (%p490_p13) target bundleno = 77 (0x4d), region = 24 }
  0x32   : > { %316 = dma.done.wait (%p491_p1), [#allocation3], 128   ;;  %p492_p0 = pmov %p491_p1 }
  0x33   : > { %s105_s3 = sand.u32 1, %s329_s7   ;;  %s190_s13 = sshll.u32 %s372_s10, 7  ;;  %v108_v0 = vld [vmem:[#allocation2] sm:$0xff] }
  0x34   : > { %318 = vsyncadd (%p492_p0), [#allocation3], 4294967168  ;;  %s188_s4 = sshll.u32 %s105_s3, 3  ;;  %s441_s18 = scalar_lea.hbm %s482_s1, %s190_s13 }
  0x35   : > { %s107_s5 = scalar_lea.vmem [#allocation5], %s188_s4  ;;  %s111_s20 = scalar_lea.sflag [#allocation4], %s105_s3 }
  0x36   : > { %s124_s11 = sshll.u32 %s107_s5, 4  ;;  %109 = vst [vmem:[%s107_s5] sm:$0xff] %v108_v0  ;;  %p493_p6 = scmp.ne.s32.totalorder %s486_s16, 0  ;;  %s436_s11 = int_to_ptr.vmem [resolvable:$true] %s124_s11 }
  0x37   : > { %s271_s21 = scalar_lea.vmem %s436_s11, 128  ;;  %s340_s22 = smov [#allocation5]  }
  0x38   : > { %p272_p5 = scmp.ne.s32.totalorder %s436_s11, %s271_s21  ;;  %s275_s10 = sshll.u32 %s340_s22, 4  ;;  %s276_s10 = int_to_ptr.vmem [resolvable:$false] %s275_s10 }
  0x39   : > { %s277_s23 = scalar_lea.vmem %s276_s10, 256  ;;  %p278_p12 = scmp.lt.s32.totalorder %s436_s11, %s276_s10 }
  0x3a   : > { %p273_p9 = pnand %p272_p5, %p493_p6  ;;  %p279_p2 = scmp.lt.s32.totalorder %s277_s23, %s271_s21 }
  0x3c   : > { %p274_p10 = pneg %p273_p9  ;;  %p280_p3 = por %p279_p2, %p278_p12 }
  0x3e   : > { %p281_p4 = pnand %p280_p3, %p274_p10 }
  0x40   : > { %284 = shalt.err (!%p281_p4)
}
  0x41   : > { %s285_s24 = scalar_lea.hbm %s441_s18, 128  ;;  %s289_s27 = scalar_lea.hbm %s482_s1, 256 }
  0x42   : > { %p286_p7 = scmp.ne.s32.totalorder %s441_s18, %s285_s24  ;;  %p290_p13 = scmp.lt.u32.totalorder %s441_s18, %s482_s1 }
  0x43   : > { %p291_p1 = scmp.lt.u32.totalorder %s289_s27, %s285_s24  ;;  %p293_p5 = scmp.lt.u32.totalorder %s285_s24, %s441_s18 }
  0x44   : > { %p287_p8 = pnand %p286_p7, %p493_p6 }
  0x45   : > { %p292_p0 = por %p291_p1, %p290_p13 }
  0x46   : > { %p288_p11 = pneg %p287_p8 }
  0x47   : > { %p294_p9 = por %p293_p5, %p292_p0 }
  0x49   : > { %p295_p10 = pnand %p294_p9, %p288_p11 }
  0x4b   : > { %298 = shalt.err (!%p295_p10)
}
  0x4c   : > { %197 = dma.vmem_to_hbm [thread:$0]  (%p493_p6), %s436_s11, 128, %s441_s18, %s111_s20  }
  0x4d PF: > { %p209_p12 = scmp.ge.s32.totalorder %s337_s9, 2  ;;  %s136_s30 = sand.u32 1, %s325_s6  }
  0x4e   : > { %p494_p2 = scmp.ne.s32.totalorder %s487_s17, 0  ;;  %s137_s2 = scalar_lea.sflag [#allocation4], %s136_s30 }
  0x50   : > { %p204_p3 = pnand %p209_p12, %p494_p2 }
  0x52   : > { %320 = dma.done.wait (!%p204_p3), %s137_s2, 128  }
  0x53   : > { %322 = vsyncadd (!%p204_p3), %s137_s2, 4294967168  ;;  %p12_p4 = scmp.ge.s32.totalorder %s376_s12, 4   ;;  %s495_s6 = smov %s329_s7 }
  0x54   : > { %s496_s7 = smov %s333_s8  ;;  %s497_s8 = smov %s387_s15 }
  0x55   : > { %s498_s9 = smov %s376_s12  ;;  %14 = sbr.rel (!%p12_p4) target bundleno = 4 (0x4), region = 61 }
  0x5c   :  { %142 = vsyncpa [#allocation3], 1 }
  0x5d   :  { %144 = vsyncpa [#allocation3 + $0x1], 1 }
  0x5e   :  { %145 = vsyncpa [#allocation4], 1 }
  0x5f   :  { %147 = vsyncpa [#allocation4 + $0x1], 1 }

// kernel: tpu_custom_call.1
= control target key start
LH: loop header
LB: loop body
LE: loop exit
PB: predicated region body
PF: predicated region fallthrough
CT: control target
= control target key end

     0   :  { %8 = vsyncpa [#allocation3], 0  ;;  %s314_s0 = inlined_call_operand.hbm [shape: f32[8,32], index: 0, kind: input, shape index: {}]   ;;  %s315_s1 = inlined_call_operand.hbm [shape: f32[32,256], index: 1, kind: input, shape index: {}]   ;;  %s316_s2 = inlined_call_operand.vmem [shape: f32[1,256], index: 2, kind: input, shape index: {}]   ;;  %s317_s3 = inlined_call_operand.hbm [shape: f32[8,256], index: 3, kind: output, shape index: {}]  }
   0x1   :  { %9 = vsyncpa [#allocation6], 0 }
   0x2   :  { %10 = vsyncpa [#allocation4], 0  ;;  %s242_s12 = smov [#allocation2]   ;;  %s243_s14 = smov [#allocation5]  }
   0x3   :  { %s17_s13 = sshll.u32 %s242_s12, 4  ;;  %s26_s15 = sshll.u32 %s243_s14, 4  ;;  %s18_s13 = int_to_ptr.vmem [resolvable:$true] %s17_s13  ;;  %s268_s15 = int_to_ptr.vmem [resolvable:$true] %s26_s15 }
   0x4   :  { %s170_s18 = scalar_lea.hbm %s314_s0, 128 }
   0x5   :  { %p171_p0 = scmp.ne.s32.totalorder %s314_s0, %s170_s18  ;;  %p174_p1 = scmp.lt.u32.totalorder %s170_s18, %s314_s0 }
   0x7   :  { %p176_p2 = pnand %p174_p1, %p171_p0 }
   0x9   :  { %179 = shalt.err (!%p176_p2)
}
   0xa   :  { %s180_s23 = scalar_lea.vmem %s18_s13, 128  ;;  %p185_p4 = scmp.lt.s32.totalorder %s18_s13, %s18_s13 }
   0xb   :  { %p181_p3 = scmp.ne.s32.totalorder %s18_s13, %s180_s23  ;;  %p186_p5 = scmp.lt.s32.totalorder %s180_s23, %s180_s23 }
   0xd   :  { %p187_p6 = por %p186_p5, %p185_p4 }
   0xf   :  { %p188_p7 = pnand %p187_p6, %p181_p3 }
  0x11   :  { %191 = shalt.err (!%p188_p7)
}
  0x12   :  { %20 = dma.hbm_to_vmem [thread:$0]  %s314_s0, 128, %s18_s13, [#allocation3]  }
  0x13   :  { %s192_s28 = scalar_lea.hbm %s315_s1, 1024 }
  0x14   :  { %p193_p8 = scmp.ne.s32.totalorder %s315_s1, %s192_s28  ;;  %p196_p9 = scmp.lt.u32.totalorder %s192_s28, %s315_s1 }
  0x16   :  { %p198_p10 = pnand %p196_p9, %p193_p8 }
  0x18   :  { %201 = shalt.err (!%p198_p10)
}
  0x19   :  { %s202_s6 = scalar_lea.vmem %s268_s15, 1024  ;;  %p207_p12 = scmp.lt.s32.totalorder %s268_s15, %s268_s15 }
  0x1a   :  { %p203_p11 = scmp.ne.s32.totalorder %s268_s15, %s202_s6  ;;  %p208_p13 = scmp.lt.s32.totalorder %s202_s6, %s202_s6 }
  0x1c   :  { %p209_p0 = por %p208_p13, %p207_p12 }
  0x1e   :  { %p210_p1 = pnand %p209_p0, %p203_p11 }
  0x20   :  { %213 = shalt.err (!%p210_p1)
}
  0x21   :  { %s244_s0 = smov 256   ;;  %s245_s7 = smov 16  }
  0x22   :  { %32 = dma.hbm_to_vmem [thread:$0]  %s315_s1, 1024, %s268_s15, [#allocation6], %s244_s0, %s244_s0, %s245_s7  }
  0x23   :  { %236 = dma.done.wait [#allocation3], 128  }
  0x24   :  { %237 = vsyncadd [#allocation3], 4294967168 }
  0x25   :  { %238 = dma.done.wait [#allocation6], 1024  }
  0x26   :  { %239 = vsyncadd [#allocation6], 4294966272  ;;  %v246_v0 = vmov 0.0   ;;  %v43_v1 = vld [vmem:[#allocation5 + $0x8] sm:$0xff]  ;;  %v45_v2 = vld [vmem:[#allocation5 + $0x18] sm:$0xff]  ;;  %vm62_vm0 = vcmask 261120   ;;  %v52_v14 = vlaneseq }
  0x27   :  { %130 = vmatprep.mubr.f32.mxu0 %v246_v0  ;;  %v42_v3 = vld [vmem:[#allocation5] sm:$0xff]  ;;  %v156_v4 = vpack.c.bf16 %v45_v2, %v43_v1  ;;  %v44_v5 = vld [vmem:[#allocation5 + $0x10] sm:$0xff]  ;;  %v47_v6 = vld [vmem:[#allocation5 + $0x28] sm:$0xff]  ;;  %s247_s11 = smov [#allocation7]  }
  0x28   :  { %v49_v7 = vld [vmem:[#allocation5 + $0x38] sm:$0xff]  ;;  %v158_v8 = vpack.c.bf16 %v44_v5, %v42_v3  ;;  %v46_v10 = vld [vmem:[#allocation5 + $0x20] sm:$0xff]  ;;  %v48_v11 = vld [vmem:[#allocation5 + $0x30] sm:$0xff]  ;;  %v53_v15 = vshrl.u32 %v52_v14, 7  ;;  %s145_s12 = sshll.u32 %s247_s11, 4  ;;  %s146_s12 = int_to_ptr.vmem [resolvable:$true] %s145_s12 }
  0x29   :  { %v160_v9 = vpack.c.bf16 %v49_v7, %v47_v6  ;;  %157 = vmatprep.subr.bf16.mxu0 %v156_v4  ;;  %v162_v12 = vpack.c.bf16 %v48_v11, %v46_v10  ;;  %v41_v13 = vld [vmem:[#allocation2] sm:$0xff]  ;;  %s214_s13 = scalar_lea.vmem %s146_s12, 256  ;;  %p219_p3 = scmp.lt.s32.totalorder %s146_s12, %s146_s12 }
  0x2a   :  { %159 = vmatpush1.bf16.msra.mxu0 %v158_v8  ;;  %v54_v16 = vsub.s32 0, %v53_v15  ;;  %v50_v17 = vld [vmem:[%s316_s2] sm:$0x3]  ;;  %v58_v18 = vsub.s32 1, %v53_v15  ;;  %p215_p2 = scmp.ne.s32.totalorder %s146_s12, %s214_s13  ;;  %p220_p4 = scmp.lt.s32.totalorder %s214_s13, %s214_s13 }
  0x2b   :  { %161 = vmatprep.subr.bf16.mxu0 %v160_v9 }
  0x2c   :  { %v55_v19 = vrot.slane %v50_v17, %v54_v16  ;;  %v59_v20 = vrot.slane %v50_v17, %v58_v18  ;;  %p221_p5 = por %p220_p4, %p219_p3 }
  0x2e   :  { %163 = vmatpush1.bf16.msra.mxu0 %v162_v12  ;;  %p222_p6 = pnand %p221_p5, %p215_p2 }
  0x31   :  { %155 = vmatmul.mubr.msk.f32.vlgmr.msra.gmra.mrb[0].mxu0 %vm62_vm0, %v41_v13 }
 0x104   :  { %v132_v21 = vpop.f32.mrb[0].mxu0 }
 0x105   :  { %v133_v22 = vadd.f32 %v132_v21, %v55_v19  ;;  %v134_v23 = vpop.f32.mrb[1].mxu0 }
 0x106   :  { %v135_v24 = vadd.f32 %v134_v23, %v59_v20 }
 0x107   :  { %137 = vst [vmem:[#allocation7] sm:$0xff] %v133_v22 }
 0x108   :  { %138 = vst [vmem:[#allocation7 + $0x8] sm:$0xff] %v135_v24 }
 0x109   :  { %225 = shalt.err (!%p222_p6)
}
 0x10a   :  { %s226_s15 = scalar_lea.hbm %s317_s3, 256 }
 0x10b   :  { %p227_p7 = scmp.ne.s32.totalorder %s317_s3, %s226_s15  ;;  %p230_p8 = scmp.lt.u32.totalorder %s226_s15, %s317_s3 }
 0x10d   :  { %p232_p9 = pnand %p230_p8, %p227_p7 }
 0x10f   :  { %235 = shalt.err (!%p232_p9)
}
 0x110   :  { %148 = dma.vmem_to_hbm [thread:$0]  %s146_s12, 256, %s317_s3, [#allocation4]  }
 0x111   :  { %240 = dma.done.wait [#allocation4], 256  }
 0x112   :  { %241 = vsyncadd [#allocation4], 4294967040 }
 0x113   :  { %152 = vsyncpa [#allocation3], 1 }
 0x114   :  { %153 = vsyncpa [#allocation6], 1 }
 0x115   :  { %154 = vsyncpa [#allocation4], 1 }

</bundles_post_ra>
